<compile_context>
chip_gen: v6e
topology: v6e:2x2x1
jax: 0.10.0
libtpu: 0.0.40
codegen_flags: <defaults>
</compile_context>

<pallas_src>
import jax
import jax.numpy as jnp
from jax.experimental import pallas as pl
from jax.experimental.pallas import tpu as pltpu


def _round_up(v, m):
    return ((v + m - 1) // m) * m


def _cause_predictor_kernel(x_ref, mask_ref, w1_ref, w2_ref, w3_ref, out_ref):
    x = x_ref[...]                                                   # (TM, Din_p) bf16
    h1 = jnp.dot(x, w1_ref[...], preferred_element_type=jnp.float32)  # MXU, f32 accum
    h1 = jnp.maximum(h1, 0.0).astype(jnp.bfloat16)                   # ReLU (dropout = identity)
    h2 = jnp.dot(h1, w2_ref[...], preferred_element_type=jnp.float32)
    h2 = jnp.maximum(h2, 0.0)                                        # ReLU (dropout = identity)
    # predictor_weight: Linear(mlp_dim, 1, bias=False) == per-row dot with w3.
    # Done as VPU broadcast-multiply + lane reduce (a width-1 MXU matmul would waste
    # >99% of the MXU output lanes).
    s = jnp.sum(h2 * w3_ref[...], axis=-1, keepdims=True)            # (TM, 1) f32
    score = pl.reciprocal(1.0 + jnp.exp(-s))                         # sigmoid on the EUP slot
    out_ref[...] = score * mask_ref[...]                             # zero out invalid positions


def init_params(key, input_dim, mlp_dim):
    k1, k2, k3 = jax.random.split(key, 3)
    s1 = 1.0 / (input_dim ** 0.5)
    s2 = 1.0 / (mlp_dim ** 0.5)
    return {
        'w1': (s1 * jax.random.normal(k1, (input_dim, mlp_dim))).astype(jnp.float32),
        'w2': (s2 * jax.random.normal(k2, (mlp_dim, mlp_dim))).astype(jnp.float32),
        'w3': (s2 * jax.random.normal(k3, (mlp_dim,))).astype(jnp.float32),
    }


def cause_predictor_forward(params, x, conv_len, mask, *, block_rows=1024):
    del conv_len  # unused by the reference forward(); kept for API parity
    B, N, Din = x.shape
    Dm = params['w1'].shape[1]
    Din_p, Dm_p = _round_up(Din, 128), _round_up(Dm, 128)

    R = B * N
    # Big row tiles amortize per-grid-step overhead; cap so the grid keeps >= ~4 steps
    # (>= 2 per TensorCore on v7x with the "parallel" axis).  Always a multiple of 8.
    TM = min(block_rows, _round_up(max(pl.cdiv(R, 4), 8), 8))
    Rp = pl.cdiv(R, TM) * TM

    # bf16 MXU operands; f32 accumulation happens inside the kernel.
    xf = x.reshape(R, Din).astype(jnp.bfloat16)
    mf = mask.reshape(R, 1).astype(jnp.float32)
    w1 = params['w1'].astype(jnp.bfloat16)
    w2 = params['w2'].astype(jnp.bfloat16)
    w3 = params['w3'].reshape(1, Dm).astype(jnp.float32)

    # Zero-pad once in the wrapper so every tile is (8,128)-aligned.  Zero padding is
    # exact here (bias-free Linears): padded columns/rows contribute nothing.
    if Rp != R:
        xf = jnp.pad(xf, ((0, Rp - R), (0, 0)))
        mf = jnp.pad(mf, ((0, Rp - R), (0, 0)))   # padded rows masked to 0, sliced off below
    if Din_p != Din:
        xf = jnp.pad(xf, ((0, 0), (0, Din_p - Din)))
        w1 = jnp.pad(w1, ((0, Din_p - Din), (0, 0)))
    if Dm_p != Dm:
        w1 = jnp.pad(w1, ((0, 0), (0, Dm_p - Dm)))
        w2 = jnp.pad(w2, ((0, Dm_p - Dm), (0, Dm_p - Dm)))
        w3 = jnp.pad(w3, ((0, 0), (0, Dm_p - Dm)))

    out = pl.pallas_call(
        _cause_predictor_kernel,
        out_shape=jax.ShapeDtypeStruct((Rp, 1), jnp.float32),
        grid_spec=pltpu.PrefetchScalarGridSpec(
            num_scalar_prefetch=0,
            grid=(Rp // TM,),
            in_specs=[pl.BlockSpec((TM, Din_p), lambda i: (i, 0)),    # x row tile (streamed)
                      pl.BlockSpec((TM, 1), lambda i: (i, 0)),        # mask row tile
                      pl.BlockSpec((Din_p, Dm_p), lambda i: (0, 0)),  # w1 (VMEM-resident)
                      pl.BlockSpec((Dm_p, Dm_p), lambda i: (0, 0)),   # w2 (VMEM-resident)
                      pl.BlockSpec((1, Dm_p), lambda i: (0, 0))],     # w3 (VMEM-resident)
            out_specs=pl.BlockSpec((TM, 1), lambda i: (i, 0))),
        compiler_params=pltpu.CompilerParams(
            dimension_semantics=("parallel",),          # independent row tiles -> dual-TC on v7x
            vmem_limit_bytes=48 * 1024 * 1024),         # room for large TM; <= v7x 64 MiB physical
    )(xf, mf, w1, w2, w3)

    return out[:R, 0].reshape(B, N)


if __name__ == "__main__":
    B, N = 2, 8
    input_dim, mlp_dim = 512, 256   # small demo dims (already 128-aligned)
    conv_len = 6

    key = jax.random.PRNGKey(0)
    kp, kx = jax.random.split(key)
    params = init_params(kp, input_dim, mlp_dim)
    x = jax.random.normal(kx, (B, N, input_dim), jnp.float32)
    # Valid-utterance mask (1 for positions < conv_len), matching how the module is used.
    mask = jnp.broadcast_to((jnp.arange(N) < conv_len).astype(jnp.float32), (B, N))

    scores = cause_predictor_forward(params, x, conv_len, mask)
    jax.block_until_ready(scores)

    # Pure-JAX reference at the SAME precision policy as the kernel (bf16 MXU operands,
    # f32 accumulation).  TODO(synk): torch reference is f64; no f64 on TPU.
    xb = x.astype(jnp.bfloat16)
    w1b = params['w1'].astype(jnp.bfloat16)
    w2b = params['w2'].astype(jnp.bfloat16)
    h1 = jnp.maximum(jnp.dot(xb, w1b, preferred_element_type=jnp.float32), 0.0)
    h2 = jnp.maximum(jnp.dot(h1.astype(jnp.bfloat16), w2b,
                             preferred_element_type=jnp.float32), 0.0)
    ref = jax.nn.sigmoid(h2 @ params['w3']) * mask

    assert scores.shape == (B, N)
    assert bool(jnp.all(jnp.isfinite(scores)))
    assert bool(jnp.allclose(scores, ref, atol=1e-4, rtol=1e-4))
    print("KERNEL_OK")
</pallas_src>

<mosaic_0001>
module attributes {stable_mosaic.version = 11 : i64} {
  func.func @_cause_predictor_kernel(%arg0: i32, %arg1: memref<8x512xbf16, #tpu.memory_space<vmem>>, %arg2: memref<8x1xf32, #tpu.memory_space<vmem>>, %arg3: memref<512x256xbf16, #tpu.memory_space<vmem>>, %arg4: memref<256x256xbf16, #tpu.memory_space<vmem>>, %arg5: memref<1x256xf32, #tpu.memory_space<vmem>>, %arg6: memref<8x1xf32, #tpu.memory_space<vmem>>) attributes {dimension_semantics = [#tpu.dimension_semantics<parallel>], iteration_bounds = array<i64: 2>, scalar_prefetch = 0 : i64, scratch_operands = 0 : i64, tpu.core_type = #tpu.core_type<tc>, window_params = [{transform_indices = @transform_0, window_bounds = array<i64: 8, 512>}, {transform_indices = @transform_1, window_bounds = array<i64: 8, 1>}, {pipeline_mode = #tpu.pipeline_mode<synchronous>, transform_indices = @transform_2, window_bounds = array<i64: 512, 256>}, {pipeline_mode = #tpu.pipeline_mode<synchronous>, transform_indices = @transform_3, window_bounds = array<i64: 256, 256>}, {pipeline_mode = #tpu.pipeline_mode<synchronous>, transform_indices = @transform_4, window_bounds = array<i64: 1, 256>}, {transform_indices = @transform_5, window_bounds = array<i64: 8, 1>}]} {
    %c0 = arith.constant 0 : index
    %c0_0 = arith.constant 0 : index
    %0 = vector.load %arg1[%c0, %c0_0] : memref<8x512xbf16, #tpu.memory_space<vmem>>, vector<8x512xbf16>
    %c0_1 = arith.constant 0 : index
    %c0_2 = arith.constant 0 : index
    %1 = vector.load %arg3[%c0_1, %c0_2] : memref<512x256xbf16, #tpu.memory_space<vmem>>, vector<512x256xbf16>
    %cst = arith.constant dense<0.000000e+00> : vector<8x256xf32>
    %2 = tpu.matmul %0, %1, %cst {dimension_numbers = #tpu.dot_dimension_numbers<[1], [0], [0], [1], [0, 0, 1, 1], [], []>} : vector<8x512xbf16>, vector<512x256xbf16>, vector<8x256xf32> -> vector<8x256xf32>
    %cst_3 = arith.constant 0.000000e+00 : f32
    %3 = vector.broadcast %cst_3 : f32 to vector<8x256xf32>
    %4 = arith.maximumf %2, %3 : vector<8x256xf32>
    %5 = arith.truncf %4 : vector<8x256xf32> to vector<8x256xbf16>
    %c0_4 = arith.constant 0 : index
    %c0_5 = arith.constant 0 : index
    %6 = vector.load %arg4[%c0_4, %c0_5] : memref<256x256xbf16, #tpu.memory_space<vmem>>, vector<256x256xbf16>
    %cst_6 = arith.constant dense<0.000000e+00> : vector<8x256xf32>
    %7 = tpu.matmul %5, %6, %cst_6 {dimension_numbers = #tpu.dot_dimension_numbers<[1], [0], [0], [1], [0, 0, 1, 1], [], []>} : vector<8x256xbf16>, vector<256x256xbf16>, vector<8x256xf32> -> vector<8x256xf32>
    %cst_7 = arith.constant 0.000000e+00 : f32
    %8 = vector.broadcast %cst_7 : f32 to vector<8x256xf32>
    %9 = arith.maximumf %7, %8 : vector<8x256xf32>
    %c0_8 = arith.constant 0 : index
    %c0_9 = arith.constant 0 : index
    %10 = vector.load %arg5[%c0_8, %c0_9] : memref<1x256xf32, #tpu.memory_space<vmem>>, vector<1x256xf32>
    %11 = vector.broadcast %10 : vector<1x256xf32> to vector<8x256xf32>
    %12 = arith.mulf %9, %11 : vector<8x256xf32>
    %cst_10 = arith.constant dense<0.000000e+00> : vector<8xf32>
    %13 = vector.multi_reduction <add>, %12, %cst_10 [1] : vector<8x256xf32> to vector<8xf32>
    %14 = vector.shape_cast %13 : vector<8xf32> to vector<8x1xf32>
    %cst_11 = arith.constant 0.000000e+00 : f32
    %15 = vector.broadcast %cst_11 : f32 to vector<8x1xf32>
    %16 = arith.subf %15, %14 : vector<8x1xf32>
    %17 = math.exp %16 : vector<8x1xf32>
    %cst_12 = arith.constant 1.000000e+00 : f32
    %18 = vector.broadcast %cst_12 : f32 to vector<8x1xf32>
    %19 = arith.addf %18, %17 : vector<8x1xf32>
    %20 = tpu.reciprocal %19 : vector<8x1xf32> -> vector<8x1xf32>
    %c0_13 = arith.constant 0 : index
    %c0_14 = arith.constant 0 : index
    %21 = vector.load %arg2[%c0_13, %c0_14] : memref<8x1xf32, #tpu.memory_space<vmem>>, vector<8x1xf32>
    %22 = arith.mulf %20, %21 : vector<8x1xf32>
    %c0_15 = arith.constant 0 : index
    %c0_16 = arith.constant 0 : index
    %23 = vector.load %arg6[%c0_15, %c0_16] : memref<8x1xf32, #tpu.memory_space<vmem>>, vector<8x1xf32>
    tpu.vector_store %arg6[%c0_15, %c0_16], %22 {strides = array<i32>} : memref<8x1xf32, #tpu.memory_space<vmem>>, vector<8x1xf32>,
    return
  }
  func.func @transform_0(%arg0: i32) -> (i32, i32) {
    %c0_i32 = arith.constant 0 : i32
    %c0_i32_0 = arith.constant 0 : i32
    return %arg0, %c0_i32 : i32, i32
  }
  func.func @transform_1(%arg0: i32) -> (i32, i32) {
    %c0_i32 = arith.constant 0 : i32
    %c0_i32_0 = arith.constant 0 : i32
    return %arg0, %c0_i32 : i32, i32
  }
  func.func @transform_2(%arg0: i32) -> (i32, i32) {
    %c0_i32 = arith.constant 0 : i32
    %c0_i32_0 = arith.constant 0 : i32
    %c0_i32_1 = arith.constant 0 : i32
    return %c0_i32, %c0_i32_0 : i32, i32
  }
  func.func @transform_3(%arg0: i32) -> (i32, i32) {
    %c0_i32 = arith.constant 0 : i32
    %c0_i32_0 = arith.constant 0 : i32
    %c0_i32_1 = arith.constant 0 : i32
    return %c0_i32, %c0_i32_0 : i32, i32
  }
  func.func @transform_4(%arg0: i32) -> (i32, i32) {
    %c0_i32 = arith.constant 0 : i32
    %c0_i32_0 = arith.constant 0 : i32
    %c0_i32_1 = arith.constant 0 : i32
    return %c0_i32, %c0_i32_0 : i32, i32
  }
  func.func @transform_5(%arg0: i32) -> (i32, i32) {
    %c0_i32 = arith.constant 0 : i32
    %c0_i32_0 = arith.constant 0 : i32
    return %arg0, %c0_i32 : i32, i32
  }
}

</mosaic_0001>

<bundles_post_ra>
// kernel: tpu_custom_call.1
= control target key start
LH: loop header
LB: loop body
LE: loop exit
PB: predicated region body
PF: predicated region fallthrough
CT: control target
= control target key end

     0   :  { %10 = vsyncpa [#allocation3], 0  ;;  %s1757_s0 = inlined_call_operand.hbm [shape: bf16[16,512], index: 0, kind: input, shape index: {}]   ;;  %s1758_s1 = inlined_call_operand.vmem [shape: f32[16,1], index: 1, kind: input, shape index: {}]   ;;  %s1759_s2 = inlined_call_operand.hbm [shape: bf16[512,256], index: 2, kind: input, shape index: {}]   ;;  %s1760_s3 = inlined_call_operand.hbm [shape: bf16[256,256], index: 3, kind: input, shape index: {}]   ;;  %s1761_s4 = inlined_call_operand.vmem [shape: f32[1,256], index: 4, kind: input, shape index: {}]   ;;  %s1762_s5 = inlined_call_operand.vmem [shape: f32[16,1], index: 5, kind: output, shape index: {}]  }
   0x1   :  { %12 = vsyncpa [#allocation3 + $0x1], 0 }
   0x2   :  { %13 = vsyncpa [#allocation5], 0  ;;  %s1616_s18 = smov 0   ;;  %s1618_s19 = smov 0  }
   0x3   :  { %s1620_s20 = smov 0   ;;  %s1622_s21 = smov 0  }
   0x4 LB: > { %s1635_s22 = sadd.s32 4294967295, %s1579_s21   ;;  %p39_p0 = scmp.ne.s32.totalorder %s1571_s19, %s1567_s18  ;;  %s1579_s21 = sphi %s1622_s21, %s1777_s21   ;;  %s1575_s20 = sphi %s1620_s20, %s1776_s20   ;;  %s1571_s19 = sphi %s1618_s19, %s1775_s19   ;;  %s1567_s18 = sphi %s1616_s18, %s1774_s18  }
   0x5   : > { %p1763_p1 = scmp.eq.s32.totalorder %s1635_s22, 0  ;;  %p1131_p2 = scmp.ge.s32.totalorder %s1579_s21, 1 }
   0x6   : > { %p165_p3 = scmp.lt.s32.totalorder %s1579_s21, 3  ;;  %s1581_s25 = smov [#allocation4]  }
   0x7   : > { %p1643_p4 = por %p1763_p1, %p39_p0  ;;  %s177_s26 = sshll.u32 %s1581_s25, 4  ;;  %s178_s26 = int_to_ptr.vmem [resolvable:$true] %s177_s26 }
   0x8   : > { %p1647_p5 = pnand %p1131_p2, %p165_p3  ;;  %s1582_s28 = smov [#allocation6]  }
   0x9   : > { %s1766_s23 = scalar_select %p1643_p4, 1, 0 }
   0xa   : > { %s1767_s24 = scalar_select %p1647_p5, 1, 0 }
   0xb   : > { %p1257_p6 = pneg %p1647_p5  ;;  %s190_s29 = sshll.u32 %s1582_s28, 4  ;;  %s191_s29 = int_to_ptr.vmem [resolvable:$true] %s190_s29 }
   0xc   : > { %s1472_s30 = scalar_lea.vmem %s178_s26, 8192  ;;  %p1480_p12 = scmp.lt.s32.totalorder %s178_s26, %s178_s26 }
   0xd   : > { %p1655_p7 = pnand %p1257_p6, %p1763_p1  ;;  %p1473_p9 = scmp.ne.s32.totalorder %s178_s26, %s1472_s30 }
   0xe   : > { %p1481_p13 = scmp.lt.s32.totalorder %s1472_s30, %s1472_s30 }
   0xf   : > { %p1463_p8 = pneg %p1655_p7 }
  0x10   : > { %p1482_p0 = por %p1481_p13, %p1480_p12 }
  0x11   : > { %p1475_p10 = pnand %p1473_p9, %p1463_p8 }
  0x13   : > { %p1476_p11 = pneg %p1475_p10 }
  0x15   : > { %p1483_p2 = pnand %p1482_p0, %p1476_p11 }
  0x17   : > { %1486 = shalt.err (!%p1483_p2)
}
  0x18   : > { %s1583_s6 = smov 128   ;;  %s1584_s7 = smov 8  }
  0x19   : > { %1260 = dma.hbm_to_vmem [thread:$0]  (!%p1655_p7), %s1759_s2, 8192, %s178_s26, [#allocation5], %s1583_s6, %s1583_s6, %s1584_s7  }
  0x1a   : > { %s1498_s10 = scalar_lea.vmem %s191_s29, 4096  ;;  %p1506_p10 = scmp.lt.s32.totalorder %s191_s29, %s191_s29 }
  0x1b   : > { %p1499_p3 = scmp.ne.s32.totalorder %s191_s29, %s1498_s10  ;;  %p1507_p1 = scmp.lt.s32.totalorder %s1498_s10, %s1498_s10 }
  0x1d   : > { %p1501_p6 = pnand %p1499_p3, %p1463_p8  ;;  %p1508_p12 = por %p1507_p1, %p1506_p10 }
  0x1f   : > { %p1502_p9 = pneg %p1501_p6 }
  0x21   : > { %p1509_p11 = pnand %p1508_p12, %p1502_p9 }
  0x23   : > { %1512 = shalt.err (!%p1509_p11)
}
  0x24   : > { %1263 = dma.hbm_to_vmem [thread:$0]  (!%p1655_p7), %s1760_s3, 4096, %s191_s29, [#allocation5], %s1583_s6, %s1583_s6, %s1584_s7  }
  0x25   : > { %s1678_s13 = sadd.s32 1, %s1579_s21   ;;  %s26_s14 = sadd.s32 1, %s1575_s20 }
  0x26   : > { %s23_s15 = ssub.s32 %s1579_s21, %s1678_s13  ;;  %p33_p1 = scmp.ne.s32.totalorder %s1575_s20, %s1571_s19 }
  0x27   : > { %p24_p8 = scmp.eq.s32.totalorder %s23_s15, 0  ;;  %p34_p13 = scmp.eq.s32.totalorder %s1579_s21, 0 }
  0x28   : > { %p1270_p0 = scmp.lt.s32.totalorder %s1579_s21, 2  ;;  %s207_s16 = sand.u32 1, %s1575_s20  }
  0x29   : > { %s1689_s17 = scalar_select %p24_p8, %s1575_s20, %s26_s14  }
  0x2a   : > { %p35_p2 = por %p34_p13, %p33_p1  ;;  %s1135_s18 = sshll.u32 %s207_s16, 4 }
  0x2b   : > { %s1246_s25 = sshll.u32 %s1579_s21, 8  ;;  %s211_s29 = scalar_lea.vmem [#allocation2], %s1135_s18 }
  0x2c   : > { %s1695_s28 = scalar_lea.hbm %s1757_s0, %s1246_s25  ;;  %s219_s30 = sshll.u32 %s211_s29, 4  ;;  %s220_s30 = int_to_ptr.vmem [resolvable:$true] %s219_s30 }
  0x2d   : > { %p1697_p7 = pnand %p1270_p0, %p35_p2  ;;  %s208_s7 = scalar_lea.sflag [#allocation3], %s207_s16 }
  0x2e   : > { %s1513_s8 = scalar_lea.hbm %s1695_s28, 256  ;;  %s1518_s10 = scalar_lea.hbm %s1757_s0, 512 }
  0x2f   : > { %p1514_p3 = scmp.ne.s32.totalorder %s1695_s28, %s1513_s8  ;;  %p1515_p6 = pneg %p1697_p7 }
  0x30   : > { %p1519_p12 = scmp.lt.s32.totalorder %s1695_s28, %s1757_s0  ;;  %p1520_p11 = scmp.lt.s32.totalorder %s1518_s10, %s1513_s8 }
  0x31   : > { %p1516_p9 = pnand %p1515_p6, %p1514_p3 }
  0x32   : > { %p1521_p1 = por %p1520_p11, %p1519_p12 }
  0x33   : > { %p1517_p10 = pneg %p1516_p9 }
  0x35   : > { %p1522_p8 = pnand %p1521_p1, %p1517_p10 }
  0x37   : > { %1525 = shalt.err (!%p1522_p8)
}
  0x38   : > { %s1526_s14 = scalar_lea.vmem %s220_s30, 256  ;;  %s1585_s15 = smov [#allocation2]  }
  0x39   : > { %p1527_p13 = scmp.ne.s32.totalorder %s220_s30, %s1526_s14  ;;  %s1531_s16 = sshll.u32 %s1585_s15, 4  ;;  %s1532_s16 = int_to_ptr.vmem [resolvable:$false] %s1531_s16 }
  0x3a   : > { %s1533_s18 = scalar_lea.vmem %s1532_s16, 512  ;;  %p1534_p3 = scmp.lt.s32.totalorder %s220_s30, %s1532_s16 }
  0x3b   : > { %p1529_p0 = pnand %p1527_p13, %p1515_p6  ;;  %p1535_p9 = scmp.lt.s32.totalorder %s1533_s18, %s1526_s14 }
  0x3d   : > { %p1530_p2 = pneg %p1529_p0  ;;  %p1536_p4 = por %p1535_p9, %p1534_p3 }
  0x3f   : > { %p1537_p5 = pnand %p1536_p4, %p1530_p2 }
  0x41   : > { %1540 = shalt.err (!%p1537_p5)
}
  0x42   : > { %1267 = dma.hbm_to_vmem [thread:$0]  (!%p1697_p7), %s1695_s28, 256, %s220_s30, %s208_s7  }
  0x43   : > { %p1770_p10 = scmp.ne.s32.totalorder %s1767_s24, 0 }
  0x44   : > { %s237_s25 = sand.u32 (!%p1770_p10), 1, %s1571_s19   ;;  %p1771_p6 = scmp.ne.s32.totalorder (!%p1770_p10), %s1766_s23, 0 }
  0x45   : > { %235 = sbr.rel (%p1770_p10) target bundleno = 722 (0x2d2), region = 40  ;;  %s1718_s26 = sshll.u32 (!%p1770_p10), %s237_s25, 4 }
  0x46   : > { %s238_s27 = scalar_lea.sflag (!%p1770_p10), [#allocation3], %s237_s25  ;;  %s241_s29 = scalar_lea.vmem (!%p1770_p10), [#allocation2], %s1718_s26 }
  0x4a   : > { %1558 = dma.done.wait (%p1771_p6), %s238_s27, 256  }
  0x4b   : > { %1560 = vsyncadd (%p1771_p6), %s238_s27, 4294967040  ;;  %p1772_p4 = scmp.eq.s32.totalorder %s1635_s22, 0 }
  0x4d   : > { %1562 = dma.done.wait (%p1772_p4), [#allocation5], 12288   ;;  %p1773_p5 = pmov %p1772_p4 }
  0x4e   : > { %v1309_v0 = vld [vmem:[#allocation4 + $0x74] ss:$8 sps:$4 sm:$0xff]   ;;  %v1313_v2 = vld [vmem:[#allocation4 + $0x70] ss:$8 sps:$4 sm:$0xff]   ;;  %v1315_v4 = vld [vmem:[#allocation4 + $0x64] ss:$8 sps:$4 sm:$0xff]  }
  0x4f   : > { %1564 = vsyncadd (%p1773_p5), [#allocation5], 4294955008  ;;  %v1311_v1 = vld [vmem:[#allocation4 + $0x174] ss:$8 sps:$4 sm:$0xff]   ;;  %687 = vmatprep.subr.bf16.mxu0 %v1309_v0  ;;  %v1314_v3 = vld [vmem:[#allocation4 + $0x170] ss:$8 sps:$4 sm:$0xff]  }
  0x50   : > { %728 = vmatprep.subr.bf16.mxu1 %v1311_v1  ;;  %688 = vmatpush1.bf16.msra.mxu0 %v1313_v2  ;;  %v1317_v5 = vld [vmem:[#allocation4 + $0x164] ss:$8 sps:$4 sm:$0xff]   ;;  %v1319_v6 = vld [vmem:[#allocation4 + $0x60] ss:$8 sps:$4 sm:$0xff]   ;;  %v1321_v8 = vld [vmem:[#allocation4 + $0x54] ss:$8 sps:$4 sm:$0xff]  }
  0x51   : > { %729 = vmatpush1.bf16.msra.mxu1 %v1314_v3  ;;  %689 = vmatprep.subr.bf16.mxu0 %v1315_v4  ;;  %v1320_v7 = vld [vmem:[#allocation4 + $0x160] ss:$8 sps:$4 sm:$0xff]   ;;  %v1323_v9 = vld [vmem:[#allocation4 + $0x154] ss:$8 sps:$4 sm:$0xff]   ;;  %v1325_v10 = vld [vmem:[#allocation4 + $0x50] ss:$8 sps:$4 sm:$0xff]  }
  0x52   : > { %730 = vmatprep.subr.bf16.mxu1 %v1317_v5  ;;  %v1326_v11 = vld [vmem:[#allocation4 + $0x150] ss:$8 sps:$4 sm:$0xff]   ;;  %v1327_v12 = vld [vmem:[#allocation4 + $0x44] ss:$8 sps:$4 sm:$0xff]   ;;  %v1331_v14 = vld [vmem:[#allocation4 + $0x40] ss:$8 sps:$4 sm:$0xff]  }
  0x53   : > { %v1329_v13 = vld [vmem:[#allocation4 + $0x144] ss:$8 sps:$4 sm:$0xff]   ;;  %v1332_v15 = vld [vmem:[#allocation4 + $0x140] ss:$8 sps:$4 sm:$0xff]   ;;  %v1333_v16 = vld [vmem:[#allocation4 + $0x34] ss:$8 sps:$4 sm:$0xff]  }
  0x54   : > { %690 = vmatpush1.bf16.msra.mxu0 %v1319_v6  ;;  %v1335_v17 = vld [vmem:[#allocation4 + $0x134] ss:$8 sps:$4 sm:$0xff]   ;;  %v1337_v18 = vld [vmem:[#allocation4 + $0x30] ss:$8 sps:$4 sm:$0xff]   ;;  %v1339_v20 = vld [vmem:[#allocation4 + $0x24] ss:$8 sps:$4 sm:$0xff]  }
  0x55   : > { %731 = vmatpush1.bf16.msra.mxu1 %v1320_v7  ;;  %691 = vmatprep.subr.bf16.mxu0 %v1321_v8  ;;  %v1338_v19 = vld [vmem:[#allocation4 + $0x130] ss:$8 sps:$4 sm:$0xff]   ;;  %v1341_v21 = vld [vmem:[#allocation4 + $0x124] ss:$8 sps:$4 sm:$0xff]   ;;  %v1343_v22 = vld [vmem:[#allocation4 + $0x20] ss:$8 sps:$4 sm:$0xff]  }
  0x56   : > { %732 = vmatprep.subr.bf16.mxu1 %v1323_v9  ;;  %v1344_v23 = vld [vmem:[#allocation4 + $0x120] ss:$8 sps:$4 sm:$0xff]   ;;  %v1345_v24 = vld [vmem:[#allocation4 + $0x14] ss:$8 sps:$4 sm:$0xff]   ;;  %v1349_v26 = vld [vmem:[#allocation4 + $0x10] ss:$8 sps:$4 sm:$0xff]  }
  0x57   : > { %v1347_v25 = vld [vmem:[#allocation4 + $0x114] ss:$8 sps:$4 sm:$0xff]   ;;  %v1350_v27 = vld [vmem:[#allocation4 + $0x110] ss:$8 sps:$4 sm:$0xff]   ;;  %v1351_v28 = vld [vmem:[#allocation4 + $0x4] ss:$8 sps:$4 sm:$0xff]  }
  0x58   : > { %692 = vmatpush1.bf16.msra.mxu0 %v1325_v10  ;;  %v1353_v29 = vld [vmem:[#allocation4 + $0x104] ss:$8 sps:$4 sm:$0xff]   ;;  %v1355_v30 = vld [vmem:[#allocation4] ss:$8 sps:$4 sm:$0xff]   ;;  %v1357_v32 = vld [vmem:[#allocation4 + $0xf4] ss:$8 sps:$4 sm:$0xff]  }
  0x59   : > { %733 = vmatpush1.bf16.msra.mxu1 %v1326_v11  ;;  %693 = vmatprep.subr.bf16.mxu0 %v1327_v12  ;;  %v1356_v31 = vld [vmem:[#allocation4 + $0x100] ss:$8 sps:$4 sm:$0xff]   ;;  %v1359_v33 = vld [vmem:[#allocation4 + $0x1f4] ss:$8 sps:$4 sm:$0xff]   ;;  %v1361_v34 = vld [vmem:[#allocation4 + $0xf0] ss:$8 sps:$4 sm:$0xff]  }
  0x5a   : > { %734 = vmatprep.subr.bf16.mxu1 %v1329_v13  ;;  %v1362_v35 = vld [vmem:[#allocation4 + $0x1f0] ss:$8 sps:$4 sm:$0xff]   ;;  %v1363_v36 = vld [vmem:[#allocation4 + $0xe4] ss:$8 sps:$4 sm:$0xff]   ;;  %v1367_v38 = vld [vmem:[#allocation4 + $0xe0] ss:$8 sps:$4 sm:$0xff]  }
  0x5b   : > { %v1365_v37 = vld [vmem:[#allocation4 + $0x1e4] ss:$8 sps:$4 sm:$0xff]   ;;  %v1368_v39 = vld [vmem:[#allocation4 + $0x1e0] ss:$8 sps:$4 sm:$0xff]   ;;  %v1369_v40 = vld [vmem:[#allocation4 + $0xd4] ss:$8 sps:$4 sm:$0xff]  }
  0x5c   : > { %694 = vmatpush1.bf16.msra.mxu0 %v1331_v14  ;;  %v1371_v41 = vld [vmem:[#allocation4 + $0x1d4] ss:$8 sps:$4 sm:$0xff]   ;;  %v1373_v42 = vld [vmem:[#allocation4 + $0xd0] ss:$8 sps:$4 sm:$0xff]   ;;  %v1375_v44 = vld [vmem:[#allocation4 + $0xc4] ss:$8 sps:$4 sm:$0xff]  }
  0x5d   : > { %735 = vmatpush1.bf16.msra.mxu1 %v1332_v15  ;;  %695 = vmatprep.subr.bf16.mxu0 %v1333_v16  ;;  %v1374_v43 = vld [vmem:[#allocation4 + $0x1d0] ss:$8 sps:$4 sm:$0xff]   ;;  %v1377_v45 = vld [vmem:[#allocation4 + $0x1c4] ss:$8 sps:$4 sm:$0xff]   ;;  %v1379_v49 = vld [vmem:[#allocation4 + $0xc0] ss:$8 sps:$4 sm:$0xff]  }
  0x5e   : > { %736 = vmatprep.subr.bf16.mxu1 %v1335_v17  ;;  %v287_v46 = vld [vmem:[%s241_s29] sm:$0xff]  ;;  %v288_v48 = vld [vmem:[%s241_s29 + $0x8] sm:$0xff]  ;;  %p279_p7 = scmp.lt.s32.totalorder %s1635_s22, 1  ;;  %vm1032_vm0 = vcmask 7168  }
  0x5f   : > { %v1145_v47 = vcombine.high %v287_v46, %v287_v46  ;;  %v1380_v50 = vld [vmem:[#allocation4 + $0x1c0] ss:$8 sps:$4 sm:$0xff]   ;;  %v1147_v51 = vcombine.high %v288_v48, %v288_v48  ;;  %v1381_v52 = vld [vmem:[#allocation4 + $0xb4] ss:$8 sps:$4 sm:$0xff]   ;;  %v1385_v54 = vld [vmem:[#allocation4 + $0xb0] ss:$8 sps:$4 sm:$0xff]   ;;  %v1144_v5 = vcombine.low %v287_v46, %v287_v46  ;;  %v1146_v6 = vcombine.low %v288_v48, %v288_v48 }
  0x60   : > { %696 = vmatpush1.bf16.msra.mxu0 %v1337_v18  ;;  %v1383_v53 = vld [vmem:[#allocation4 + $0x1b4] ss:$8 sps:$4 sm:$0xff]   ;;  %v1386_v55 = vld [vmem:[#allocation4 + $0x1b0] ss:$8 sps:$4 sm:$0xff]   ;;  %v1387_v56 = vld [vmem:[#allocation4 + $0xa4] ss:$8 sps:$4 sm:$0xff]  }
  0x61   : > { %737 = vmatpush1.bf16.msra.mxu1 %v1338_v19  ;;  %697 = vmatprep.subr.bf16.mxu0 %v1339_v20  ;;  %v1389_v57 = vld [vmem:[#allocation4 + $0x1a4] ss:$8 sps:$4 sm:$0xff]   ;;  %v1391_v58 = vld [vmem:[#allocation4 + $0xa0] ss:$8 sps:$4 sm:$0xff]   ;;  %v1393_v60 = vld [vmem:[#allocation4 + $0x94] ss:$8 sps:$4 sm:$0xff]  }
  0x62   : > { %738 = vmatprep.subr.bf16.mxu1 %v1341_v21  ;;  %719 = vmatprep.mubr.bf16.mxu0 %v1145_v47  ;;  %v1392_v59 = vld [vmem:[#allocation4 + $0x1a0] ss:$8 sps:$4 sm:$0xff]   ;;  %v1395_v61 = vld [vmem:[#allocation4 + $0x194] ss:$8 sps:$4 sm:$0xff]   ;;  %v1397_v62 = vld [vmem:[#allocation4 + $0x90] ss:$8 sps:$4 sm:$0xff]  }
  0x63   : > { %760 = vmatprep.mubr.bf16.mxu1 %v1147_v51  ;;  %v1398_v63 = vld [vmem:[#allocation4 + $0x190] ss:$8 sps:$4 sm:$0xff]   ;;  %v1399_v0 = vld [vmem:[#allocation4 + $0x84] ss:$8 sps:$4 sm:$0xff]   ;;  %v1403_v2 = vld [vmem:[#allocation4 + $0x80] ss:$8 sps:$4 sm:$0xff]  }
  0x64   : > { %698 = vmatpush1.bf16.msra.mxu0 %v1343_v22  ;;  %v1401_v1 = vld [vmem:[#allocation4 + $0x184] ss:$8 sps:$4 sm:$0xff]   ;;  %v1404_v3 = vld [vmem:[#allocation4 + $0x180] ss:$8 sps:$4 sm:$0xff]   ;;  %v1411_v4 = vld [vmem:[#allocation6 + $0x74] ss:$8 sps:$4 sm:$0xff]  }
  0x65   : > { %739 = vmatpush1.bf16.msra.mxu1 %v1344_v23  ;;  %699 = vmatprep.subr.bf16.mxu0 %v1345_v24  ;;  %v1409_v7 = vld [vmem:[#allocation6 + $0x70] ss:$8 sps:$4 sm:$0xff]   ;;  %v1414_v8 = vld [vmem:[#allocation6 + $0x64] ss:$8 sps:$4 sm:$0xff]   ;;  %v1412_v9 = vld [vmem:[#allocation6 + $0x60] ss:$8 sps:$4 sm:$0xff]  }
  0x66   : > { %740 = vmatprep.subr.bf16.mxu1 %v1347_v25  ;;  %v1417_v10 = vld [vmem:[#allocation6 + $0x54] ss:$8 sps:$4 sm:$0xff]   ;;  %v1415_v11 = vld [vmem:[#allocation6 + $0x50] ss:$8 sps:$4 sm:$0xff]   ;;  %v1420_v12 = vld [vmem:[#allocation6 + $0x44] ss:$8 sps:$4 sm:$0xff]  }
  0x67   : > { %v1418_v13 = vld [vmem:[#allocation6 + $0x40] ss:$8 sps:$4 sm:$0xff]   ;;  %v1423_v14 = vld [vmem:[#allocation6 + $0x34] ss:$8 sps:$4 sm:$0xff]   ;;  %v1421_v15 = vld [vmem:[#allocation6 + $0x30] ss:$8 sps:$4 sm:$0xff]  }
  0x68   : > { %700 = vmatpush1.bf16.msra.mxu0 %v1349_v26  ;;  %v1426_v16 = vld [vmem:[#allocation6 + $0x24] ss:$8 sps:$4 sm:$0xff]   ;;  %v1424_v17 = vld [vmem:[#allocation6 + $0x20] ss:$8 sps:$4 sm:$0xff]   ;;  %v1429_v18 = vld [vmem:[#allocation6 + $0x14] ss:$8 sps:$4 sm:$0xff]  }
  0x69   : > { %741 = vmatpush1.bf16.msra.mxu1 %v1350_v27  ;;  %701 = vmatprep.subr.bf16.mxu0 %v1351_v28  ;;  %v1427_v19 = vld [vmem:[#allocation6 + $0x10] ss:$8 sps:$4 sm:$0xff]   ;;  %v1432_v20 = vld [vmem:[#allocation6 + $0x4] ss:$8 sps:$4 sm:$0xff]   ;;  %v1430_v21 = vld [vmem:[#allocation6] ss:$8 sps:$4 sm:$0xff]  }
  0x6a   : > { %742 = vmatprep.subr.bf16.mxu1 %v1353_v29  ;;  %v1435_v22 = vld [vmem:[#allocation6 + $0xf4] ss:$8 sps:$4 sm:$0xff]   ;;  %v1433_v23 = vld [vmem:[#allocation6 + $0xf0] ss:$8 sps:$4 sm:$0xff]   ;;  %v1438_v24 = vld [vmem:[#allocation6 + $0xe4] ss:$8 sps:$4 sm:$0xff]  }
  0x6b   : > { %v1436_v25 = vld [vmem:[#allocation6 + $0xe0] ss:$8 sps:$4 sm:$0xff]   ;;  %v1441_v26 = vld [vmem:[#allocation6 + $0xd4] ss:$8 sps:$4 sm:$0xff]   ;;  %v1439_v27 = vld [vmem:[#allocation6 + $0xd0] ss:$8 sps:$4 sm:$0xff]  }
  0x6c   : > { %702 = vmatpush1.bf16.msra.mxu0 %v1355_v30  ;;  %v1444_v28 = vld [vmem:[#allocation6 + $0xc4] ss:$8 sps:$4 sm:$0xff]   ;;  %v1442_v29 = vld [vmem:[#allocation6 + $0xc0] ss:$8 sps:$4 sm:$0xff]   ;;  %v1447_v30 = vld [vmem:[#allocation6 + $0xb4] ss:$8 sps:$4 sm:$0xff]  }
  0x6d   : > { %743 = vmatpush1.bf16.msra.mxu1 %v1356_v31  ;;  %703 = vmatprep.subr.bf16.mxu0 %v1357_v32  ;;  %v1445_v31 = vld [vmem:[#allocation6 + $0xb0] ss:$8 sps:$4 sm:$0xff]   ;;  %v1450_v32 = vld [vmem:[#allocation6 + $0xa4] ss:$8 sps:$4 sm:$0xff]   ;;  %s1779_s22 = smov (!%p279_p7, %s1635_s22), 1 }
  0x6e   : > { %744 = vmatprep.subr.bf16.mxu1 %v1359_v33  ;;  %v1448_v33 = vld [vmem:[#allocation6 + $0xa0] ss:$8 sps:$4 sm:$0xff]   ;;  %s1142_s28 = sshll.u32 %s1779_s22, 3 }
  0x6f   : > { %s282_s7 = scalar_lea.vmem %s1758_s1, %s1142_s28  ;;  %s286_s9 = scalar_lea.vmem %s1762_s5, %s1142_s28 }
  0x70   : > { %704 = vmatpush2.bf16.msra.mxu0 %v1361_v34  ;;  %v1453_v34 = vld [vmem:[#allocation6 + $0x94] ss:$8 sps:$4 sm:$0xff]  }
  0x71   : > { %745 = vmatpush2.bf16.msra.mxu1 %v1362_v35  ;;  %705 = vmatprep.subr.bf16.mxu0 %v1363_v36  ;;  %v1451_v35 = vld [vmem:[#allocation6 + $0x90] ss:$8 sps:$4 sm:$0xff]   ;;  %v1456_v36 = vld [vmem:[#allocation6 + $0x84] ss:$8 sps:$4 sm:$0xff]  }
  0x72   : > { %746 = vmatprep.subr.bf16.mxu1 %v1365_v37  ;;  %v1454_v37 = vld [vmem:[#allocation6 + $0x80] ss:$8 sps:$4 sm:$0xff]  }
  0x74   : > { %706 = vmatpush2.bf16.msra.mxu0 %v1367_v38 }
  0x75   : > { %747 = vmatpush2.bf16.msra.mxu1 %v1368_v39  ;;  %707 = vmatprep.subr.bf16.mxu0 %v1369_v40 }
  0x76   : > { %748 = vmatprep.subr.bf16.mxu1 %v1371_v41 }
  0x78   : > { %708 = vmatpush2.bf16.msra.mxu0 %v1373_v42 }
  0x79   : > { %749 = vmatpush2.bf16.msra.mxu1 %v1374_v43  ;;  %709 = vmatprep.subr.bf16.mxu0 %v1375_v44 }
  0x7a   : > { %750 = vmatprep.subr.bf16.mxu1 %v1377_v45 }
  0x7c   : > { %710 = vmatpush2.bf16.msra.mxu0 %v1379_v49 }
  0x7d   : > { %751 = vmatpush2.bf16.msra.mxu1 %v1380_v50  ;;  %711 = vmatprep.subr.bf16.mxu0 %v1381_v52  ;;  %v1010_v52 = vlaneseq }
  0x7e   : > { %752 = vmatprep.subr.bf16.mxu1 %v1383_v53 }
  0x7f   : > { %v1011_v53 = vshrl.u32 %v1010_v52, 7 }
  0x80   : > { %712 = vmatpush2.bf16.msra.mxu0 %v1385_v54 }
  0x81   : > { %753 = vmatpush2.bf16.msra.mxu1 %v1386_v55  ;;  %713 = vmatprep.subr.bf16.mxu0 %v1387_v56  ;;  %v1012_v54 = vsub.s32 0, %v1011_v53  ;;  %v1016_v55 = vsub.s32 1, %v1011_v53  ;;  %v1008_v56 = vld [vmem:[%s1761_s4] sm:$0x3] }
  0x82   : > { %754 = vmatprep.subr.bf16.mxu1 %v1389_v57 }
  0x84   : > { %714 = vmatpush2.bf16.msra.mxu0 %v1391_v58 }
  0x85   : > { %755 = vmatpush2.bf16.msra.mxu1 %v1392_v59  ;;  %715 = vmatprep.subr.bf16.mxu0 %v1393_v60  ;;  %v1013_v59 = vrot.slane %v1008_v56, %v1012_v54  ;;  %v1017_v60 = vrot.slane %v1008_v56, %v1016_v55 }
  0x86   : > { %756 = vmatprep.subr.bf16.mxu1 %v1395_v61 }
  0x88   : > { %716 = vmatpush2.bf16.msra.mxu0 %v1397_v62 }
  0x89   : > { %757 = vmatpush2.bf16.msra.mxu1 %v1398_v63  ;;  %717 = vmatprep.subr.bf16.mxu0 %v1399_v0 }
  0x8a   : > { %758 = vmatprep.subr.bf16.mxu1 %v1401_v1 }
  0x8c   : > { %718 = vmatpush2.bf16.msra.mxu0 %v1403_v2 }
  0x8d   : > { %759 = vmatpush2.bf16.msra.mxu1 %v1404_v3  ;;  %965 = vmatprep.subr.bf16.mxu0 %v1411_v4 }
  0x8f   : > { %720 = vmatmul.mubr.bf16.vlgmr.msra.gmra.mxu0 %v1144_v5 }
  0x90   : > { %761 = vmatmul.mubr.bf16.vlgmr.msra.gmra.mxu1 %v1146_v6  ;;  %966 = vmatpush1.bf16.msra.mxu0 %v1409_v7 }
  0x91   : > { %967 = vmatprep.subr.bf16.mxu0 %v1414_v8 }
  0x94   : > { %968 = vmatpush1.bf16.msra.mxu0 %v1412_v9  ;;  %v1030_v9 = vld [vmem:[%s282_s7] sm:$0xff] }
  0x95   : > { %969 = vmatprep.subr.bf16.mxu0 %v1417_v10 }
  0x98   : > { %970 = vmatpush1.bf16.msra.mxu0 %v1415_v11 }
  0x99   : > { %971 = vmatprep.subr.bf16.mxu0 %v1420_v12 }
  0x9c   : > { %972 = vmatpush1.bf16.msra.mxu0 %v1418_v13 }
  0x9d   : > { %973 = vmatprep.subr.bf16.mxu0 %v1423_v14 }
  0xa0   : > { %974 = vmatpush1.bf16.msra.mxu0 %v1421_v15 }
  0xa1   : > { %975 = vmatprep.subr.bf16.mxu0 %v1426_v16 }
  0xa4   : > { %976 = vmatpush1.bf16.msra.mxu0 %v1424_v17 }
  0xa5   : > { %977 = vmatprep.subr.bf16.mxu0 %v1429_v18 }
  0xa8   : > { %978 = vmatpush1.bf16.msra.mxu0 %v1427_v19 }
  0xa9   : > { %979 = vmatprep.subr.bf16.mxu0 %v1432_v20 }
  0xac   : > { %980 = vmatpush1.bf16.msra.mxu0 %v1430_v21 }
  0xad   : > { %981 = vmatprep.subr.bf16.mxu0 %v1435_v22 }
  0xb0   : > { %982 = vmatpush2.bf16.msra.mxu0 %v1433_v23 }
  0xb1   : > { %983 = vmatprep.subr.bf16.mxu0 %v1438_v24 }
  0xb4   : > { %984 = vmatpush2.bf16.msra.mxu0 %v1436_v25 }
  0xb5   : > { %985 = vmatprep.subr.bf16.mxu0 %v1441_v26 }
  0xb8   : > { %986 = vmatpush2.bf16.msra.mxu0 %v1439_v27 }
  0xb9   : > { %987 = vmatprep.subr.bf16.mxu0 %v1444_v28 }
  0xbc   : > { %988 = vmatpush2.bf16.msra.mxu0 %v1442_v29 }
  0xbd   : > { %989 = vmatprep.subr.bf16.mxu0 %v1447_v30 }
  0xc0   : > { %990 = vmatpush2.bf16.msra.mxu0 %v1445_v31 }
  0xc1   : > { %991 = vmatprep.subr.bf16.mxu0 %v1450_v32 }
  0xc4   : > { %992 = vmatpush2.bf16.msra.mxu0 %v1448_v33 }
  0xc5   : > { %993 = vmatprep.subr.bf16.mxu0 %v1453_v34 }
  0xc8   : > { %994 = vmatpush2.bf16.msra.mxu0 %v1451_v35 }
  0xc9   : > { %995 = vmatprep.subr.bf16.mxu0 %v1456_v36 }
  0xcc   : > { %996 = vmatpush2.bf16.msra.mxu0 %v1454_v37 }
 0x14f   : > { %v721_v38 = vpop.f32.mrf.mxu0 }
 0x150   : > { %v762_v39 = vpop.f32.mrf.mxu1 }
 0x151   : > { %v763_v40 = vadd.f32 %v762_v39, %v721_v38  ;;  %v723_v41 = vpop.f32.mrf.mxu0 }
 0x152   : > { %v764_v42 = vpop.f32.mrf.mxu1 }
 0x153   : > { %v765_v43 = vadd.f32 %v764_v42, %v723_v41  ;;  %v769_v44 = vmax.f32 %v763_v40, 0.0  ;;  %v725_v45 = vpop.f32.mrf.mxu0 }
 0x154   : > { %v766_v46 = vpop.f32.mrf.mxu1 }
 0x155   : > { %v770_v47 = vmax.f32 %v765_v43, 0.0  ;;  %v726_v48 = vpop.f32.mrf.mxu0  ;;  %v771_v51 = vpack.c.bf16 %v769_v44, %v769_v44 }
 0x156   : > { %v767_v49 = vpop.f32.mrf.mxu1 }
 0x157   : > { %v772_v50 = vpack.c.bf16 %v770_v47, %v770_v47 }
 0x159   : > { %997 = vmatprep.mubr.bf16.mxu0 %v772_v50 }
 0x15a   : > { %998 = vmatmul.mubr.bf16.vlgmr.msra.gmra.mxu0 %v771_v51 }
 0x21a   : > { %v999_v57 = vpop.f32.mrf.mxu0 }
 0x21b   : > { %v1006_v58 = vmax.f32 %v999_v57, 0.0 }
 0x21c   : > { %v1001_v61 = vpop.f32.mrf.mxu0 }
 0x21d   : > { %v1007_v62 = vmax.f32 %v1001_v61, 0.0  ;;  %v1020_v0 = vmul.f32 %v1013_v59, %v1006_v58 }
 0x21e   : > { %v1003_v63 = vpop.f32.mrf.mxu0 }
 0x21f   : > { %v1021_v1 = vmul.f32 %v1017_v60, %v1007_v62 }
 0x220   : > { %v1004_v2 = vpop.f32.mrf.mxu0 }
 0x221   : > { %v1022_v3 = vadd.f32 %v1021_v1, %v1020_v0 }
 0x223   : > { %1023 = vadd.xlane.f32.xlu0 %v1022_v3 }
 0x2ac   : > { %v1024_v4 = vpop.xlane.xlu0 %1023 }
 0x2ad   : > { %v1025_v5 = vsub.f32 0.0, %v1024_v4 }
 0x2af   : > { %v1026_v6 = vmul.f32 1.442695, %v1025_v5 }
 0x2b1   : > { %1457 = vpow2.f32 %v1026_v6 }
 0x2be   : > { %v1458_v7 = vpop.eup %1457 }
 0x2bf   : > { %v1028_v8 = vadd.f32 1.0, %v1458_v7 }
 0x2c1   : > { %1459 = vrcp.f32 %v1028_v8 }
 0x2ce   : > { %v1460_v10 = vpop.eup %1459 }
 0x2cf   : > { %v1031_v11 = vmul.f32 %v1460_v10, %v1030_v9 }
 0x2d1   : > { %1033 = vst.msk [vmem:[%s286_s9] sm:$0xff] %vm1032_vm0, %v1031_v11 }
 0x2d2 PF: > { %p16_p12 = scmp.ge.s32.totalorder %s1678_s13, 4   ;;  %s1774_s18 = smov %s1571_s19 }
 0x2d3   : > { %s1775_s19 = smov %s1575_s20  ;;  %s1776_s20 = smov %s1689_s17 }
 0x2d4   : > { %s1777_s21 = smov %s1678_s13  ;;  %18 = sbr.rel (!%p16_p12) target bundleno = 4 (0x4), region = 91 }
 0x2d9   :  { %1053 = vsyncpa [#allocation3], 1 }
 0x2da   :  { %1055 = vsyncpa [#allocation3 + $0x1], 1 }
 0x2db   :  { %1056 = vsyncpa [#allocation5], 1 }

</bundles_post_ra>
